<compile_context>
chip_gen: v7x
topology: tpu7x:2x2x1
jax: 0.10.0
libtpu: 0.0.40
codegen_flags: <defaults>
</compile_context>

<pallas_src>
import functools

import jax
import jax.numpy as jnp
from jax.experimental import pallas as pl
from jax.experimental.pallas import tpu as pltpu


def gaussian_kernel(h_ref, w_ref, b_ref, out_ref, *, out_size, compute_dtype):
    h = h_ref[...]                      # (tm, H)
    w = w_ref[...]                      # (H, 2*O), VMEM-resident across grid
    if compute_dtype is not None:
        # bf16 MXU inputs, f32 accumulation (v6e / v7x fast path).
        h = h.astype(compute_dtype)
        w = w.astype(compute_dtype)

    # Fused matmul for both heads + single bias broadcast-add (f32 epilogue).
    y = jnp.dot(h, w, preferred_element_type=jnp.float32) + b_ref[...]

    # mu half: pure VPU path, no transcendentals.
    out_ref[:, :out_size] = y[:, :out_size].astype(out_ref.dtype)

    # sigma half: numerically stable softplus + 1e-6 (only O columns hit EUP).
    s = y[:, out_size:]
    sigma = jnp.maximum(s, 0.0) + jnp.log(1.0 + jnp.exp(-jnp.abs(s))) + 1e-6
    out_ref[:, out_size:] = sigma.astype(out_ref.dtype)


def gaussian_forward(h, w_mu, b_mu, w_sigma, b_sigma, *, tm=512,
                     compute_dtype=None):
    """h: (B, H); w_*: (H, O); b_*: (O,).  Returns (mu, sigma), each (B, O).

    B may be the flattened batch*time dimension of deepAR so a whole sequence
    is handled by a single pallas_call instead of one call per step.
    """
    B, H = h.shape
    O = w_mu.shape[1]

    # Fuse the two heads into one weight / bias (done once, outside the grid).
    w = jnp.concatenate([w_mu, w_sigma], axis=1)             # (H, 2*O)
    b = jnp.concatenate([b_mu, b_sigma]).reshape(1, 2 * O)   # (1, 2*O)

    # Row tiling: a single full-extent block for small B, otherwise tiles of
    # tm rows (multiple of 8 sublanes) with zero-padding of the last tile.
    if B <= tm:
        tm_eff, padded_b = B, B
    else:
        tm_eff = -(-tm // 8) * 8
        padded_b = pl.cdiv(B, tm_eff) * tm_eff
    h_p = h if padded_b == B else jnp.pad(h, ((0, padded_b - B), (0, 0)))

    kernel = functools.partial(gaussian_kernel, out_size=O,
                               compute_dtype=compute_dtype)

    out = pl.pallas_call(
        kernel,
        out_shape=jax.ShapeDtypeStruct((padded_b, 2 * O), jnp.float32),
        grid=(padded_b // tm_eff,),
        in_specs=[
            pl.BlockSpec((tm_eff, H), lambda i: (i, 0)),   # streamed rows
            pl.BlockSpec((H, 2 * O), lambda i: (0, 0)),    # resident weights
            pl.BlockSpec((1, 2 * O), lambda i: (0, 0)),    # resident bias
        ],
        out_specs=pl.BlockSpec((tm_eff, 2 * O), lambda i: (i, 0)),
        compiler_params=pltpu.CompilerParams(
            dimension_semantics=("parallel",)),
    )(h_p, w, b)

    mu = out[:B, :O]
    sigma = out[:B, O:]
    return mu, sigma


def _reference(h, w_mu, b_mu, w_sigma, b_sigma):
    mu = h @ w_mu + b_mu
    sigma = jnp.log(1.0 + jnp.exp(h @ w_sigma + b_sigma)) + 1e-6
    return mu, sigma


if __name__ == "__main__":
    key = jax.random.PRNGKey(0)
    k_h, k_wm, k_bm, k_ws, k_bs, k_h2 = jax.random.split(key, 6)

    batch, hidden_size, output_size = 8, 32, 16

    h = jax.random.normal(k_h, (batch, hidden_size), dtype=jnp.float32)

    # PyTorch nn.Linear shapes are W (O, H), b (O,); store W transposed (H, O).
    bound = 1.0 / (hidden_size ** 0.5)
    w_mu = jax.random.uniform(k_wm, (hidden_size, output_size),
                              minval=-bound, maxval=bound, dtype=jnp.float32)
    b_mu = jax.random.uniform(k_bm, (output_size,),
                              minval=-bound, maxval=bound, dtype=jnp.float32)
    w_sigma = jax.random.uniform(k_ws, (hidden_size, output_size),
                                 minval=-bound, maxval=bound, dtype=jnp.float32)
    b_sigma = jax.random.uniform(k_bs, (output_size,),
                                 minval=-bound, maxval=bound, dtype=jnp.float32)

    # --- small batch, f32 matmul (strict check against plain-JAX reference) ---
    mu, sigma = gaussian_forward(h, w_mu, b_mu, w_sigma, b_sigma)
    jax.block_until_ready((mu, sigma))
    mu_ref, sigma_ref = _reference(h, w_mu, b_mu, w_sigma, b_sigma)
    assert mu.shape == (batch, output_size) and sigma.shape == (batch, output_size)
    assert jnp.allclose(mu, mu_ref, atol=1e-5, rtol=1e-5)
    assert jnp.allclose(sigma, sigma_ref, atol=1e-5, rtol=1e-5)
    assert bool(jnp.all(sigma > 0))

    # --- large (batch*time) rows: exercises the tiled "parallel" grid path ---
    big_b = 1000                                    # not a multiple of tm -> padding
    h_big = jax.random.normal(k_h2, (big_b, hidden_size), dtype=jnp.float32)
    mu_b, sigma_b = gaussian_forward(h_big, w_mu, b_mu, w_sigma, b_sigma, tm=512)
    jax.block_until_ready((mu_b, sigma_b))
    mu_b_ref, sigma_b_ref = _reference(h_big, w_mu, b_mu, w_sigma, b_sigma)
    assert jnp.allclose(mu_b, mu_b_ref, atol=1e-5, rtol=1e-5)
    assert jnp.allclose(sigma_b, sigma_b_ref, atol=1e-5, rtol=1e-5)

    # --- bf16 MXU inputs / f32 accumulate (v6e / v7x fast path), loose check ---
    mu_l, sigma_l = gaussian_forward(h_big, w_mu, b_mu, w_sigma, b_sigma,
                                     tm=512, compute_dtype=jnp.bfloat16)
    jax.block_until_ready((mu_l, sigma_l))
    assert jnp.allclose(mu_l, mu_b_ref, atol=5e-2, rtol=5e-2)
    assert jnp.allclose(sigma_l, sigma_b_ref, atol=5e-2, rtol=5e-2)
    assert bool(jnp.all(sigma_l > 0))

    print("KERNEL_OK")
</pallas_src>

<mosaic_0001>
module attributes {stable_mosaic.version = 11 : i64} {
  func.func @gaussian_kernel(%arg0: i32, %arg1: memref<8x32xf32, #tpu.memory_space<vmem>>, %arg2: memref<32x32xf32, #tpu.memory_space<vmem>>, %arg3: memref<1x32xf32, #tpu.memory_space<vmem>>, %arg4: memref<8x32xf32, #tpu.memory_space<vmem>>) attributes {dimension_semantics = [#tpu.dimension_semantics<parallel>], iteration_bounds = array<i64: 1>, scalar_prefetch = 0 : i64, scratch_operands = 0 : i64, tpu.core_type = #tpu.core_type<tc>, window_params = [{transform_indices = @transform_0, window_bounds = array<i64: 8, 32>}, {pipeline_mode = #tpu.pipeline_mode<synchronous>, transform_indices = @transform_1, window_bounds = array<i64: 32, 32>}, {pipeline_mode = #tpu.pipeline_mode<synchronous>, transform_indices = @transform_2, window_bounds = array<i64: 1, 32>}, {transform_indices = @transform_3, window_bounds = array<i64: 8, 32>}]} {
    %c0 = arith.constant 0 : index
    %c0_0 = arith.constant 0 : index
    %0 = vector.load %arg1[%c0, %c0_0] : memref<8x32xf32, #tpu.memory_space<vmem>>, vector<8x32xf32>
    %c0_1 = arith.constant 0 : index
    %c0_2 = arith.constant 0 : index
    %1 = vector.load %arg2[%c0_1, %c0_2] : memref<32x32xf32, #tpu.memory_space<vmem>>, vector<32x32xf32>
    %cst = arith.constant dense<0.000000e+00> : vector<8x32xf32>
    %2 = tpu.matmul %0, %1, %cst {dimension_numbers = #tpu.dot_dimension_numbers<[1], [0], [0], [1], [0, 0, 1, 1], [], []>} : vector<8x32xf32>, vector<32x32xf32>, vector<8x32xf32> -> vector<8x32xf32>
    %c0_3 = arith.constant 0 : index
    %c0_4 = arith.constant 0 : index
    %3 = vector.load %arg3[%c0_3, %c0_4] : memref<1x32xf32, #tpu.memory_space<vmem>>, vector<1x32xf32>
    %4 = vector.broadcast %3 : vector<1x32xf32> to vector<8x32xf32>
    %5 = arith.addf %2, %4 : vector<8x32xf32>
    %6 = vector.extract_strided_slice %5 {offsets = [0, 0], sizes = [8, 16], strides = [1, 1]} : vector<8x32xf32> to vector<8x16xf32>
    %c0_5 = arith.constant 0 : index
    %c0_6 = arith.constant 0 : index
    %7 = vector.load %arg4[%c0_5, %c0_6] : memref<8x32xf32, #tpu.memory_space<vmem>>, vector<8x16xf32>
    tpu.vector_store %arg4[%c0_5, %c0_6], %6 {strides = array<i32>} : memref<8x32xf32, #tpu.memory_space<vmem>>, vector<8x16xf32>,
    %8 = vector.extract_strided_slice %5 {offsets = [0, 16], sizes = [8, 16], strides = [1, 1]} : vector<8x32xf32> to vector<8x16xf32>
    %cst_7 = arith.constant 0.000000e+00 : f32
    %9 = vector.broadcast %cst_7 : f32 to vector<8x16xf32>
    %10 = arith.maximumf %8, %9 : vector<8x16xf32>
    %11 = math.absf %8 : vector<8x16xf32>
    %cst_8 = arith.constant 0.000000e+00 : f32
    %12 = vector.broadcast %cst_8 : f32 to vector<8x16xf32>
    %13 = arith.subf %12, %11 : vector<8x16xf32>
    %14 = math.exp %13 : vector<8x16xf32>
    %cst_9 = arith.constant 1.000000e+00 : f32
    %15 = vector.broadcast %cst_9 : f32 to vector<8x16xf32>
    %16 = arith.addf %15, %14 : vector<8x16xf32>
    %17 = math.log %16 : vector<8x16xf32>
    %18 = arith.addf %10, %17 : vector<8x16xf32>
    %cst_10 = arith.constant 9.99999997E-7 : f32
    %19 = vector.broadcast %cst_10 : f32 to vector<8x16xf32>
    %20 = arith.addf %18, %19 : vector<8x16xf32>
    %c0_11 = arith.constant 0 : index
    %c16 = arith.constant 16 : index
    %21 = vector.load %arg4[%c0_11, %c16] : memref<8x32xf32, #tpu.memory_space<vmem>>, vector<8x16xf32>
    tpu.vector_store %arg4[%c0_11, %c16], %20 {strides = array<i32>} : memref<8x32xf32, #tpu.memory_space<vmem>>, vector<8x16xf32>,
    return
  }
  func.func @transform_0(%arg0: i32) -> (i32, i32) {
    %c0_i32 = arith.constant 0 : i32
    %c0_i32_0 = arith.constant 0 : i32
    return %arg0, %c0_i32 : i32, i32
  }
  func.func @transform_1(%arg0: i32) -> (i32, i32) {
    %c0_i32 = arith.constant 0 : i32
    %c0_i32_0 = arith.constant 0 : i32
    %c0_i32_1 = arith.constant 0 : i32
    return %c0_i32, %c0_i32_0 : i32, i32
  }
  func.func @transform_2(%arg0: i32) -> (i32, i32) {
    %c0_i32 = arith.constant 0 : i32
    %c0_i32_0 = arith.constant 0 : i32
    %c0_i32_1 = arith.constant 0 : i32
    return %c0_i32, %c0_i32_0 : i32, i32
  }
  func.func @transform_3(%arg0: i32) -> (i32, i32) {
    %c0_i32 = arith.constant 0 : i32
    %c0_i32_0 = arith.constant 0 : i32
    return %arg0, %c0_i32 : i32, i32
  }
}

</mosaic_0001>

<bundles_post_ra>
// kernel: tpu_custom_call.1
= control target key start
LH: loop header
LB: loop body
LE: loop exit
PB: predicated region body
PF: predicated region fallthrough
CT: control target
= control target key end

     0   :  { %8 = vsyncpa [#allocation3], 0  ;;  %s339_s0 = inlined_call_operand.hbm [shape: f32[8,32], index: 0, kind: input, shape index: {}]   ;;  %s340_s1 = inlined_call_operand.hbm [shape: f32[32,32], index: 1, kind: input, shape index: {}]   ;;  %s341_s2 = inlined_call_operand.vmem [shape: f32[1,32], index: 2, kind: input, shape index: {}]   ;;  %s342_s3 = inlined_call_operand.hbm [shape: f32[8,32], index: 3, kind: output, shape index: {}]  }
   0x1   :  { %9 = vsyncpa [#allocation6], 0 }
   0x2   :  { %10 = vsyncpa [#allocation4], 0  ;;  %s265_s12 = smov [#allocation2]   ;;  %s266_s14 = smov [#allocation5]  }
   0x3   :  { %s17_s13 = sshll.u32 %s265_s12, 4  ;;  %s26_s15 = sshll.u32 %s266_s14, 4  ;;  %s18_s13 = int_to_ptr.vmem [resolvable:$true] %s17_s13  ;;  %s293_s15 = int_to_ptr.vmem [resolvable:$true] %s26_s15 }
   0x4   :  { %s193_s18 = scalar_lea.hbm %s339_s0, 128 }
   0x5   :  { %p194_p0 = scmp.ne.s32.totalorder %s339_s0, %s193_s18  ;;  %p197_p1 = scmp.lt.u32.totalorder %s193_s18, %s339_s0 }
   0x7   :  { %p199_p2 = pnand %p197_p1, %p194_p0 }
   0x9   :  { %202 = shalt.err (!%p199_p2)
}
   0xa   :  { %s203_s23 = scalar_lea.vmem %s18_s13, 128  ;;  %p208_p4 = scmp.lt.s32.totalorder %s18_s13, %s18_s13 }
   0xb   :  { %p204_p3 = scmp.ne.s32.totalorder %s18_s13, %s203_s23  ;;  %p209_p5 = scmp.lt.s32.totalorder %s203_s23, %s203_s23 }
   0xd   :  { %p210_p6 = por %p209_p5, %p208_p4 }
   0xf   :  { %p211_p7 = pnand %p210_p6, %p204_p3 }
  0x11   :  { %214 = shalt.err (!%p211_p7)
}
  0x12   :  { %20 = dma.hbm_to_vmem [thread:$0]  %s339_s0, 128, %s18_s13, [#allocation3]  }
  0x13   :  { %s215_s28 = scalar_lea.hbm %s340_s1, 512 }
  0x14   :  { %p216_p8 = scmp.ne.s32.totalorder %s340_s1, %s215_s28  ;;  %p219_p9 = scmp.lt.u32.totalorder %s215_s28, %s340_s1 }
  0x16   :  { %p221_p10 = pnand %p219_p9, %p216_p8 }
  0x18   :  { %224 = shalt.err (!%p221_p10)
}
  0x19   :  { %s225_s6 = scalar_lea.vmem %s293_s15, 512  ;;  %p230_p12 = scmp.lt.s32.totalorder %s293_s15, %s293_s15 }
  0x1a   :  { %p226_p11 = scmp.ne.s32.totalorder %s293_s15, %s225_s6  ;;  %p231_p13 = scmp.lt.s32.totalorder %s225_s6, %s225_s6 }
  0x1c   :  { %p232_p0 = por %p231_p13, %p230_p12 }
  0x1e   :  { %p233_p1 = pnand %p232_p0, %p226_p11 }
  0x20   :  { %236 = shalt.err (!%p233_p1)
}
  0x21   :  { %s267_s0 = smov 128   ;;  %s268_s7 = smov 8  }
  0x22   :  { %32 = dma.hbm_to_vmem [thread:$0]  %s340_s1, 512, %s293_s15, [#allocation6], %s267_s0, %s267_s0, %s268_s7  }
  0x23   :  { %259 = dma.done.wait [#allocation3], 128  }
  0x24   :  { %260 = vsyncadd [#allocation3], 4294967168 }
  0x25   :  { %261 = dma.done.wait [#allocation6], 512  }
  0x26   :  { %262 = vsyncadd [#allocation6], 4294966784  ;;  %v269_v0 = vmov 0.0|0.0   ;;  %vm270_vm0 = vmmov 0   ;;  %v271_v1 = vmov 0.0   ;;  %v42_v2 = vld [vmem:[#allocation5] sm:$0xff] }
  0x27   :  { %175 = vmatprep.subr.bf16.mxu0 %v269_v0  ;;  %172 = vmatprep.mubr.msk.f32.mxu0 %vm270_vm0, %v271_v1  ;;  %v43_v3 = vld [vmem:[#allocation5 + $0x8] sm:$0xff]  ;;  %v44_v4 = vld [vmem:[#allocation5 + $0x10] sm:$0xff]  ;;  %v45_v6 = vld [vmem:[#allocation5 + $0x18] sm:$0xff]  ;;  %vm53_vm1 = vcmask 261120   ;;  %vm127_vm2 = vcmask 130048   ;;  %s272_s11 = smov [#allocation7]  }
  0x28   :  { %v176_v5 = vpack.c.bf16 %v43_v3, %v42_v2  ;;  %v179_v7 = vpack.c.bf16 %v45_v6, %v44_v4  ;;  %v41_v8 = vld [vmem:[#allocation2] sm:$0xff]  ;;  %s147_s12 = sshll.u32 %s272_s11, 4  ;;  %vm139_vm3 = vcmask 261248   ;;  %s148_s12 = int_to_ptr.vmem [resolvable:$true] %s147_s12 }
  0x29   :  { %v157_v9 = vld [vmem:[%s341_s2] ss:$0 sm:$0xff]  ;;  %s237_s2 = scalar_lea.vmem %s148_s12, 128  ;;  %p242_p3 = scmp.lt.s32.totalorder %s148_s12, %s148_s12 }
  0x2a   :  { %177 = vmatpush3.bf16.msra.mxu0 %v176_v5  ;;  %p238_p2 = scmp.ne.s32.totalorder %s148_s12, %s237_s2  ;;  %p243_p4 = scmp.lt.s32.totalorder %s237_s2, %s237_s2 }
  0x2b   :  { %178 = vmatprep.subr.bf16.mxu0 %v269_v0 }
  0x2c   :  { %p244_p5 = por %p243_p4, %p242_p3 }
  0x2e   :  { %180 = vmatpush3.bf16.msra.mxu0 %v179_v7  ;;  %p245_p6 = pnand %p244_p5, %p238_p2 }
  0x31   :  { %173 = vmatmul.mubr.msk.f32.vlgmr.msra.gmra.mrb[0].mxu0 %vm53_vm1, %v41_v8 }
 0x104   :  { %v123_v10 = vpop.f32.mrb[0].mxu0 }
 0x105   :  { %v124_v11 = vadd.f32 %v157_v9, %v123_v10  ;;  %v174_v12 = vpop.f32.mrb[1].mxu0 }
 0x107   :  { %128 = vst.msk [vmem:[#allocation7] sm:$0xff] %vm127_vm2, %v124_v11  ;;  %v130_v13 = vand.u32 2147483647, %v124_v11  ;;  %v129_v19 = vmax.f32 %v124_v11, 0.0 }
 0x109   :  { %v131_v14 = vsub.f32 0.0, %v130_v13 }
 0x10b   :  { %v132_v15 = vmul.f32 1.442695, %v131_v14 }
 0x10d   :  { %189 = vpow2.f32 %v132_v15 }
 0x117   :  { %v190_v16 = vpop.eup %189 }
 0x118   :  { %v134_v17 = vadd.f32 1.0, %v190_v16 }
 0x11a   :  { %191 = vlog2.f32 %v134_v17 }
 0x124   :  { %v192_v18 = vpop.eup %191 }
 0x125   :  { %v136_v20 = vmul.f32 0.6931472, %v192_v18 }
 0x127   :  { %v137_v21 = vadd.f32 %v136_v20, %v129_v19 }
 0x129   :  { %v138_v22 = vadd.f32 1e-06, %v137_v21 }
 0x12b   :  { %140 = vst.msk [vmem:[#allocation7] sm:$0xff] %vm139_vm3, %v138_v22 }
 0x12c   :  { %248 = shalt.err (!%p245_p6)
}
 0x12d   :  { %s249_s15 = scalar_lea.hbm %s342_s3, 128 }
 0x12e   :  { %p250_p7 = scmp.ne.s32.totalorder %s342_s3, %s249_s15  ;;  %p253_p8 = scmp.lt.u32.totalorder %s249_s15, %s342_s3 }
 0x130   :  { %p255_p9 = pnand %p253_p8, %p250_p7 }
 0x132   :  { %258 = shalt.err (!%p255_p9)
}
 0x133   :  { %150 = dma.vmem_to_hbm [thread:$0]  %s148_s12, 128, %s342_s3, [#allocation4]  }
 0x134   :  { %263 = dma.done.wait [#allocation4], 128  }
 0x135   :  { %264 = vsyncadd [#allocation4], 4294967168 }
 0x136   :  { %154 = vsyncpa [#allocation3], 1 }
 0x137   :  { %155 = vsyncpa [#allocation6], 1 }
 0x138   :  { %156 = vsyncpa [#allocation4], 1 }

</bundles_post_ra>
